<compile_context>
chip_gen: v7x
topology: tpu7x:2x2x1
jax: 0.10.0
libtpu: 0.0.40
codegen_flags: <defaults>
</compile_context>

<pallas_src>
import jax
import jax.numpy as jnp
from jax.experimental import pallas as pl
from jax.experimental.pallas import tpu as pltpu


def _round_up(n, m):
    return ((n + m - 1) // m) * m


def _cdiv(a, b):
    return -(-a // b)


# ---------------------------------------------------------------------------
# Kernel: one lane-dense GEMV tile per grid step.
#   x_ref: (block_b, in_dim)   w_ref: (1, in_dim)   b_ref: (1, 1)
#   o_ref: (1, block_b)        o[0, j] = sum_k w[0, k] * x[j, k] + b
# ---------------------------------------------------------------------------
def mlp_folded_kernel(x_ref, w_ref, b_ref, o_ref):
    y = jax.lax.dot_general(
        w_ref[...], x_ref[...],
        dimension_numbers=(((1,), (1,)), ((), ())),
        preferred_element_type=jnp.float32)              # (1, block_b)
    o_ref[...] = (y + b_ref[...]).astype(o_ref.dtype)


def fold_affine_params(params):
    """Collapse the Linear chain (torch layout W:(out,in), b:(out,)) into one
    effective (1, in_dim) row weight and (1, 1) bias.

    Valid for EVAL mode only (Dropout == identity).  Call once per parameter
    set and reuse the result so the per-call path is just the pallas_call."""
    w_eff = None
    b_eff = None
    for W, b in params:
        Wt = jnp.asarray(W, jnp.float32).T               # (in, out)
        bv = jnp.asarray(b, jnp.float32)
        if w_eff is None:
            w_eff, b_eff = Wt, bv
        else:
            w_eff = w_eff @ Wt
            b_eff = b_eff @ Wt + bv
    assert w_eff.shape[1] == 1, "final layer must have out_features == 1"
    w_row = w_eff.T                                      # (1, in_dim)
    b_2d = b_eff.reshape(1, 1)
    return w_row, b_2d


def _x_tile_byte_budget():
    """Per-generation byte budget for one (double-buffered) x tile."""
    vmem = None
    try:
        vmem = getattr(pltpu.get_tpu_info(), "vmem_capacity_bytes", None)
    except Exception:
        vmem = None
    if vmem is not None and vmem <= (64 << 20):
        # v7x: 64 MiB VMEM, ~3.2 TB/s HBM -> large tiles; 2x8 MiB double-
        # buffered x + outputs stays under the 32 MiB scoped-VMEM default.
        return 8 << 20
    # v5e/v6e: 2x4 MiB double-buffered x + outputs fits the 16/32 MiB scoped
    # defaults while already sitting near the HBM roofline.
    return 4 << 20


def _choose_block_b(B, in_dim, itemsize=4):
    """Byte-budgeted, lane/MXU-aligned batch tile."""
    tile_bytes = _x_tile_byte_budget()
    block_b = max(tile_bytes // (in_dim * itemsize), 128)
    block_b = _round_up(block_b, 128)
    # Never allocate a tile much larger than the (lane-padded) batch.
    block_b = min(block_b, _round_up(B, 128))
    # Keep >=2 grid steps when the batch allows it so ("parallel",) semantics
    # can shard the grid across both v7x TensorCores.
    if B >= 2 * 128:
        block_b = min(block_b, _round_up(_cdiv(B, 2), 128))
    return max(block_b, 128)


def mlp_forward_folded(x, w_row, b_2d, *, block_b=None):
    """Eval-mode forward of the folded MLP.  x: (B, in_dim) f32 -> (B, 1)."""
    B, in_dim = x.shape
    assert w_row.shape == (1, in_dim)

    if block_b is None:
        bb = _choose_block_b(B, in_dim)
    else:
        bb = max(_round_up(int(block_b), 128), 128)

    # Only pad when a single tile exceeds the whole batch (B < 128): that copy
    # is <128 rows, negligible.  Otherwise there is NO pad copy: the grid is
    # cdiv(B, bb) and the OOB tail rows of the last x block are don't-care data
    # feeding only output lanes >= B, which are sliced off below.
    if B < bb:
        x = jnp.pad(x, ((0, bb - B), (0, 0)))
    rows = x.shape[0]
    grid = _cdiv(rows, bb)
    out_lanes = grid * bb        # lane-dense output slab, all stores unmasked

    out = pl.pallas_call(
        mlp_folded_kernel,
        out_shape=jax.ShapeDtypeStruct((1, out_lanes), jnp.float32),
        grid_spec=pltpu.PrefetchScalarGridSpec(
            num_scalar_prefetch=0,
            grid=(grid,),
            in_specs=[
                pl.BlockSpec((bb, in_dim), lambda i: (i, 0)),   # x stream
                pl.BlockSpec((1, in_dim), lambda i: (0, 0)),    # folded W row
                pl.BlockSpec((1, 1), lambda i: (0, 0)),         # folded bias
            ],
            out_specs=pl.BlockSpec((1, bb), lambda i: (0, i)),  # lane-dense
        ),
        compiler_params=pltpu.CompilerParams(
            dimension_semantics=("parallel",)),
        cost_estimate=pl.CostEstimate(
            flops=2 * B * in_dim,
            transcendentals=0,
            bytes_accessed=B * in_dim * 4 + B * 4 + in_dim * 4 + 4),
    )(x, w_row, b_2d)

    return out[0, :B].reshape(B, 1)


def mlp_forward(x, params, *, training=False, block_b=None):
    """Convenience wrapper: fold + launch.  Eval mode only."""
    if training:
        raise NotImplementedError(
            "Train-mode Dropout invalidates the affine fold; only the eval-mode "
            "forward (Dropout == identity) is implemented.")
    w_row, b_2d = fold_affine_params(params)
    return mlp_forward_folded(x, w_row, b_2d, block_b=block_b)


def init_params(key, input_size):
    """Matches the PyTorch module init: W ~ N(0, (1/(input_size+1))^2), b = 0."""
    sizes = [(1024, input_size), (128, 1024), (64, 128), (16, 64), (1, 16)]
    std = 1.0 / (input_size + 1)
    params = []
    for (out_f, in_f) in sizes:
        key, sub = jax.random.split(key)
        W = jax.random.normal(sub, (out_f, in_f), dtype=jnp.float32) * std
        b = jnp.zeros((out_f,), dtype=jnp.float32)
        params.append((W, b))
    return params


def mlp_reference(x, params):
    # Layer-by-layer reference (dropout is identity in eval mode).
    h = x
    for W, b in params:
        h = h @ W.T + b
    return h


if __name__ == "__main__":
    key = jax.random.PRNGKey(0)
    input_size = 32
    batch = 8

    k_x, k_p, k_b, k_x2 = jax.random.split(key, 4)
    x = jax.random.normal(k_x, (batch, input_size), dtype=jnp.float32)
    params = init_params(k_p, input_size)

    # Fold once (hoisted out of the launch path); jit just the pallas launch.
    w_row, b_2d = fold_affine_params(params)
    fwd = jax.jit(mlp_forward_folded, static_argnames=("block_b",))

    # Test 1: tiny batch (exercises the single-tile / small-pad path).
    out = jax.block_until_ready(fwd(x, w_row, b_2d))
    ref = mlp_reference(x, params)
    assert out.shape == (batch, 1), out.shape
    assert jnp.allclose(out, ref, atol=1e-4, rtol=1e-4), (
        "mismatch vs pure-JAX reference (zero-bias init)")

    # Test 2: nonzero random biases (so a dropped/misplaced bias can't hide),
    # a batch that is not a multiple of the block, multi-step "parallel" grid,
    # and the no-pad partial-last-block path.
    bkeys = jax.random.split(k_b, len(params))
    params_nz = [(W, 0.1 * jax.random.normal(bk, b.shape, dtype=jnp.float32))
                 for (W, b), bk in zip(params, bkeys)]
    w_row2, b_2d2 = fold_affine_params(params_nz)
    x2 = jax.random.normal(k_x2, (300, input_size), dtype=jnp.float32)

    out2 = jax.block_until_ready(fwd(x2, w_row2, b_2d2))            # auto block
    out3 = jax.block_until_ready(fwd(x2, w_row2, b_2d2, block_b=128))  # 3-step grid
    ref2 = mlp_reference(x2, params_nz)
    assert out2.shape == (300, 1), out2.shape
    assert jnp.allclose(out2, ref2, atol=1e-4, rtol=1e-4), (
        "mismatch vs pure-JAX reference (nonzero biases, auto block)")
    assert jnp.allclose(out3, ref2, atol=1e-4, rtol=1e-4), (
        "mismatch vs pure-JAX reference (nonzero biases, block_b=128)")

    print("KERNEL_OK")
</pallas_src>

<mosaic_0001>
module attributes {stable_mosaic.version = 11 : i64} {
  func.func @mlp_folded_kernel(%arg0: i32, %arg1: memref<128x32xf32, #tpu.memory_space<vmem>>, %arg2: memref<1x32xf32, #tpu.memory_space<vmem>>, %arg3: memref<1x1xf32, #tpu.memory_space<vmem>>, %arg4: memref<1x128xf32, #tpu.memory_space<vmem>>) attributes {dimension_semantics = [#tpu.dimension_semantics<parallel>], iteration_bounds = array<i64: 1>, scalar_prefetch = 0 : i64, scratch_operands = 0 : i64, tpu.core_type = #tpu.core_type<tc>, window_params = [{transform_indices = @transform_0, window_bounds = array<i64: 128, 32>}, {pipeline_mode = #tpu.pipeline_mode<synchronous>, transform_indices = @transform_1, window_bounds = array<i64: 1, 32>}, {pipeline_mode = #tpu.pipeline_mode<synchronous>, transform_indices = @transform_2, window_bounds = array<i64: 1, 1>}, {transform_indices = @transform_3, window_bounds = array<i64: 1, 128>}]} {
    %c0 = arith.constant 0 : index
    %c0_0 = arith.constant 0 : index
    %0 = vector.load %arg2[%c0, %c0_0] : memref<1x32xf32, #tpu.memory_space<vmem>>, vector<1x32xf32>
    %c0_1 = arith.constant 0 : index
    %c0_2 = arith.constant 0 : index
    %1 = vector.load %arg1[%c0_1, %c0_2] : memref<128x32xf32, #tpu.memory_space<vmem>>, vector<128x32xf32>
    %cst = arith.constant dense<0.000000e+00> : vector<1x128xf32>
    %2 = tpu.matmul %0, %1, %cst {dimension_numbers = #tpu.dot_dimension_numbers<[1], [1], [0], [0], [0, 0, 1, 0], [], []>} : vector<1x32xf32>, vector<128x32xf32>, vector<1x128xf32> -> vector<1x128xf32>
    %c0_3 = arith.constant 0 : index
    %c0_4 = arith.constant 0 : index
    %3 = vector.load %arg3[%c0_3, %c0_4] : memref<1x1xf32, #tpu.memory_space<vmem>>, vector<1x1xf32>
    %4 = vector.broadcast %3 : vector<1x1xf32> to vector<1x128xf32>
    %5 = arith.addf %2, %4 : vector<1x128xf32>
    %c0_5 = arith.constant 0 : index
    %c0_6 = arith.constant 0 : index
    %6 = vector.load %arg4[%c0_5, %c0_6] : memref<1x128xf32, #tpu.memory_space<vmem>>, vector<1x128xf32>
    tpu.vector_store %arg4[%c0_5, %c0_6], %5 {strides = array<i32>} : memref<1x128xf32, #tpu.memory_space<vmem>>, vector<1x128xf32>,
    return
  }
  func.func @transform_0(%arg0: i32) -> (i32, i32) {
    %c0_i32 = arith.constant 0 : i32
    %c0_i32_0 = arith.constant 0 : i32
    return %arg0, %c0_i32 : i32, i32
  }
  func.func @transform_1(%arg0: i32) -> (i32, i32) {
    %c0_i32 = arith.constant 0 : i32
    %c0_i32_0 = arith.constant 0 : i32
    %c0_i32_1 = arith.constant 0 : i32
    return %c0_i32, %c0_i32_0 : i32, i32
  }
  func.func @transform_2(%arg0: i32) -> (i32, i32) {
    %c0_i32 = arith.constant 0 : i32
    %c0_i32_0 = arith.constant 0 : i32
    %c0_i32_1 = arith.constant 0 : i32
    return %c0_i32, %c0_i32_0 : i32, i32
  }
  func.func @transform_3(%arg0: i32) -> (i32, i32) {
    %c0_i32 = arith.constant 0 : i32
    %c0_i32_0 = arith.constant 0 : i32
    return %c0_i32, %arg0 : i32, i32
  }
}

</mosaic_0001>

<bundles_post_ra>
// kernel: mlp_forward_folded.1
= control target key start
LH: loop header
LB: loop body
LE: loop exit
PB: predicated region body
PF: predicated region fallthrough
CT: control target
= control target key end

     0   :  { %vm43_vm0 = vcmask 261120   ;;  %v276_v0 = vmov 0.0|0.0   ;;  %vm277_vm2 = vmmov 0   ;;  %v278_v4 = vmov 0.0   ;;  %s380_s0 = inlined_call_operand.vmem [shape: f32[128,32], index: 0, kind: input, shape index: {}]   ;;  %s381_s2 = inlined_call_operand.<no memory space> [shape: f32[1,1], index: 2, kind: input, shape index: {}]   ;;  %s382_s1 = inlined_call_operand.vmem [shape: f32[1,32], index: 1, kind: input, shape index: {}]   ;;  %s383_s3 = inlined_call_operand.vmem [shape: f32[1,128], index: 3, kind: output, shape index: {}]  }
   0x1   :  { %239 = vmatprep.subr.bf16.mxu0 %v276_v0  ;;  %v17_v1 = vld [vmem:[%s380_s0] sm:$0xff]  ;;  %v18_v2 = vld [vmem:[%s380_s0 + $0x8] sm:$0xff]  ;;  %vm308_vm1 = vmpackc.low %vm43_vm0, %vm43_vm0  ;;  %236 = vmatprep.mubr.msk.f32.mxu0 %vm277_vm2, %v278_v4  ;;  %v8_v5 = vstv %s381_s2  ;;  %v279_v7 = vmov 0   ;;  %v39_v31 = vlaneseq }
   0x2   :  { %v240_v6 = vpack.c.bf16 %v18_v2, %v17_v1  ;;  %275 = vset.pattern.permute.xlu0 %v279_v7  ;;  %9 = vst [vmem:[#allocation2] sm:$0x1] %v8_v5  ;;  %v19_v8 = vld [vmem:[%s380_s0 + $0x10] sm:$0xff]  ;;  %v20_v9 = vld [vmem:[%s380_s0 + $0x18] sm:$0xff]  ;;  %v21_v12 = vld [vmem:[%s380_s0 + $0x20] sm:$0xff] }
   0x3   :  { %v244_v10 = vpack.c.bf16 %v20_v9, %v19_v8  ;;  %v22_v13 = vld [vmem:[%s380_s0 + $0x28] sm:$0xff]  ;;  %v23_v15 = vld [vmem:[%s380_s0 + $0x30] sm:$0xff]  ;;  %v24_v16 = vld [vmem:[%s380_s0 + $0x38] sm:$0xff]  ;;  %v40_v32 = vshrl.u32 %v39_v31, 7 }
   0x4   :  { %242 = vmatpush3.bf16.xpose.msk.msra.mxu0 %vm308_vm1, %v240_v6  ;;  %v248_v14 = vpack.c.bf16 %v22_v13, %v21_v12  ;;  %v252_v17 = vpack.c.bf16 %v24_v16, %v23_v15  ;;  %v25_v18 = vld [vmem:[%s380_s0 + $0x40] sm:$0xff]  ;;  %v26_v19 = vld [vmem:[%s380_s0 + $0x48] sm:$0xff]  ;;  %v27_v21 = vld [vmem:[%s380_s0 + $0x50] sm:$0xff] }
   0x5   :  { %243 = vmatprep.subr.bf16.mxu0 %v276_v0  ;;  %v256_v20 = vpack.c.bf16 %v26_v19, %v25_v18  ;;  %v28_v22 = vld [vmem:[%s380_s0 + $0x58] sm:$0xff]  ;;  %v29_v24 = vld [vmem:[%s380_s0 + $0x60] sm:$0xff]  ;;  %v30_v25 = vld [vmem:[%s380_s0 + $0x68] sm:$0xff]  ;;  %v41_v33 = vsub.s32 0, %v40_v32 }
   0x6   :  { %v260_v23 = vpack.c.bf16 %v28_v22, %v27_v21  ;;  %v264_v26 = vpack.c.bf16 %v30_v25, %v29_v24  ;;  %v31_v27 = vld [vmem:[%s380_s0 + $0x70] sm:$0xff]  ;;  %v32_v28 = vld [vmem:[%s380_s0 + $0x78] sm:$0xff]  ;;  %v16_v30 = vld [vmem:[%s382_s1] sm:$0x1] }
   0x7   :  { %v268_v29 = vpack.c.bf16 %v32_v28, %v31_v27 }
   0x9   :  { %v33_v11 = vld [vmem:[#allocation2] sm:$0x1] }
   0xa   :  { %36 = vperm.xlu0 %275, %v33_v11  }
   0xc   :  { %246 = vmatpush3.bf16.xpose.msk.msra.mxu0 %vm308_vm1, %v244_v10 }
   0xd   :  { %247 = vmatprep.subr.bf16.mxu0 %v276_v0 }
  0x14   :  { %250 = vmatpush3.bf16.xpose.msk.msra.mxu0 %vm308_vm1, %v248_v14 }
  0x15   :  { %251 = vmatprep.subr.bf16.mxu0 %v276_v0 }
  0x1c   :  { %254 = vmatpush3.bf16.xpose.msk.msra.mxu0 %vm308_vm1, %v252_v17 }
  0x1d   :  { %255 = vmatprep.subr.bf16.mxu0 %v276_v0 }
  0x24   :  { %258 = vmatpush3.bf16.xpose.msk.msra.mxu0 %vm308_vm1, %v256_v20 }
  0x25   :  { %259 = vmatprep.subr.bf16.mxu0 %v276_v0 }
  0x2c   :  { %262 = vmatpush3.bf16.xpose.msk.msra.mxu0 %vm308_vm1, %v260_v23 }
  0x2d   :  { %263 = vmatprep.subr.bf16.mxu0 %v276_v0 }
  0x34   :  { %266 = vmatpush3.bf16.xpose.msk.msra.mxu0 %vm308_vm1, %v264_v26 }
  0x35   :  { %267 = vmatprep.subr.bf16.mxu0 %v276_v0 }
  0x3c   :  { %270 = vmatpush3.bf16.xpose.msk.msra.mxu0 %vm308_vm1, %v268_v29 }
  0x43   :  { %237 = vmatmul.mubr.msk.f32.vlgmr.msra.gmra.mrb[0].mxu0 %vm43_vm0, %v16_v30 }
  0x89   :  { %v37_v34 = vpop.permute.xlu0 %36 }
  0x8a   :  { %v42_v35 = vrot.slane %v37_v34, %v41_v33 }
 0x116   :  { %v161_v36 = vpop.f32.mrb[0].mxu0 }
 0x117   :  { %v162_v37 = vadd.f32 %v161_v36, %v42_v35  ;;  %v238_v38 = vpop.f32.mrb[1].mxu0 }
 0x119   :  { %165 = vst [vmem:[%s383_s3] sm:$0x1] %v162_v37 }

</bundles_post_ra>
